<compile_context>
chip_gen: v5e
topology: v5e:2x2
jax: 0.10.0
libtpu: 0.0.40
codegen_flags: <defaults>
</compile_context>

<pallas_src>
import functools

import jax
import jax.numpy as jnp
from jax import lax
from jax.experimental import pallas as pl
from jax.experimental.pallas import tpu as pltpu


def _round_up(x, m):
    return (x + m - 1) // m * m


def _pad_axis(x, axis, new_size):
    pad = new_size - x.shape[axis]
    if pad <= 0:
        return x
    widths = [(0, 0)] * x.ndim
    widths[axis] = (0, pad)
    return jnp.pad(x, widths)


def _vmem_capacity_bytes():
    """Per-core VMEM capacity; conservative fallback if the query fails."""
    try:
        info = pltpu.get_tpu_info()
        cap = getattr(info, "vmem_capacity_bytes", None)
        if cap:
            return int(cap)
    except Exception:
        pass
    return 64 * 1024 * 1024  # v7x per-TC size: safe lower bound


def _sdpa_kernel(q_ref, k_ref, v_ref, out_ref, attn_ref, logattn_ref, *,
                 inv_temperature, lk_real, lk_pad, qk_dtype):
    # Blocks: q (bb, tq, D), k (bb, Lk_pad, D), v (bb, Lk_pad, Dv_pad).
    # Fold 1/temperature into q (bb*tq*D elems instead of bb*tq*Lk logits).
    q = q_ref[...] * inv_temperature
    k = k_ref[...]
    if qk_dtype is not None:          # optional bf16 QK^T for f32 inputs
        q = q.astype(qk_dtype)
        k = k.astype(qk_dtype)

    # Batched QK^T on the MXU with f32 accumulation, contracting over D for both
    # operands (no explicit transpose of k).
    s = lax.dot_general(
        q, k,
        dimension_numbers=(((2,), (2,)), ((0,), (0,))),
        preferred_element_type=jnp.float32)          # (bb, tq, Lk_pad)

    # Mask padded key columns so they never contribute to max/sum.
    if lk_pad != lk_real:
        col = lax.broadcasted_iota(jnp.int32, s.shape, 2)
        s = jnp.where(col < lk_real, s, jnp.float32(-1e30))

    # Numerically-stable softmax / log_softmax along the last axis (torch dim=2).
    # Order chosen so `s`/`t` are dead before `attn` peaks (<= ~3 live slabs).
    m = jnp.max(s, axis=-1, keepdims=True)
    t = s - m
    e = jnp.exp(t)
    denom = jnp.sum(e, axis=-1, keepdims=True)
    logattn_ref[...] = (t - jnp.log(denom)).astype(logattn_ref.dtype)

    # Exact reciprocal: returned rows sum to 1, exp(log_attn) == attn.
    attn = e * pl.reciprocal(denom)
    attn_ref[...] = attn.astype(attn_ref.dtype)

    # P @ V in v's dtype (bf16-native MXU path when v is bf16), f32 accumulation.
    v = v_ref[...]
    out = lax.dot_general(
        attn.astype(v.dtype), v,
        dimension_numbers=(((2,), (1,)), ((0,), (0,))),
        preferred_element_type=jnp.float32)          # (bb, tq, Dv_pad)
    out_ref[...] = out.astype(out_ref.dtype)


def _plan_tiles(B, Lq, Lk_pad, D, Dv_pad, in_bytes, out_bytes, vmem_budget):
    """Pick (batch_block, q_tile, padded_Lq, kv_buffer_count) under a VMEM budget."""

    def cost(bb, tq, kv_buf):
        out_blocks = 2 * bb * tq * (2 * Lk_pad + Dv_pad) * out_bytes  # dbl-buffered outputs
        q_block = 2 * bb * tq * D * in_bytes                          # dbl-buffered q
        temps = 3 * bb * tq * Lk_pad * 4                              # live f32 slabs
        kv_blocks = kv_buf * bb * Lk_pad * (D + Dv_pad) * in_bytes    # k + v blocks
        return out_blocks + q_block + temps + kv_blocks

    kv_buf = 2
    if Lq <= 512 and cost(1, Lq, 2) <= vmem_budget:
        tq, lq_pad = Lq, Lq                         # small sequence: one tile, no padding
    else:
        lq_pad = _round_up(Lq, 128)                 # minimal padding, MXU-friendly tiles
        tq = None
        for kvb in (2, 1):
            for t in (1024, 512, 256, 128):
                if lq_pad % t == 0 and cost(1, t, kvb) <= vmem_budget:
                    tq, kv_buf = t, kvb
                    break
            if tq is not None:
                break
        if tq is None:                              # best effort for huge Lk
            tq, kv_buf = 128, 1

    # Pack several batch elements per grid step when the Lq tile is tiny, to
    # amortize the ~0.35 us per-step overhead.
    bb = 1
    if tq < 128:
        target = max(1, 256 // max(tq, 1))
        for d in range(1, B + 1):
            if B % d == 0 and d <= target and cost(d, tq, kv_buf) <= vmem_budget:
                bb = d
    return bb, tq, lq_pad, kv_buf


def scaled_dot_product_attention(q, k, v, temperature, *, attn_dtype=None,
                                 qk_bf16=False):
    """Pallas version of ScaledDotProductAttention.forward (eval mode).

    q: [B, Lq, D], k: [B, Lk, D], v: [B, Lk, Dv]
    Returns (output [B, Lq, Dv], attn [B, Lq, Lk], log_attn [B, Lq, Lk]).
    attn_dtype: optional override for attn/log_attn output dtype (e.g. bf16 to
                halve the dominant writeback bytes).
    qk_bf16:    run QK^T with bf16 operands (f32 accumulation) even for f32 input.
    """
    B, Lq, D = q.shape
    Bk, Lk, Dk = k.shape
    Bv, Lkv, Dv = v.shape
    assert B == Bk == Bv and D == Dk and Lk == Lkv

    out_dtype = q.dtype
    attn_dtype = out_dtype if attn_dtype is None else jnp.dtype(attn_dtype)

    # Lane-dense output stores: pad the last dims of the big outputs up to
    # multiples of 128 (only when >= 128, so tiny dims are not inflated).
    Lk_pad = _round_up(Lk, 128) if Lk >= 128 else Lk
    Dv_pad = _round_up(Dv, 128) if Dv >= 128 else Dv

    in_bytes = jnp.dtype(q.dtype).itemsize
    out_bytes = jnp.dtype(attn_dtype).itemsize

    vmem_cap = _vmem_capacity_bytes()
    bb, tq, Lq_pad, kv_buf = _plan_tiles(
        B, Lq, Lk_pad, D, Dv_pad, in_bytes, out_bytes, vmem_budget=vmem_cap // 2)

    qp = _pad_axis(q, 1, Lq_pad)
    kp = _pad_axis(k, 1, Lk_pad)
    vp = _pad_axis(_pad_axis(v, 1, Lk_pad), 2, Dv_pad)

    grid = (B // bb, Lq_pad // tq)

    kernel = functools.partial(
        _sdpa_kernel,
        inv_temperature=1.0 / float(temperature),
        lk_real=Lk, lk_pad=Lk_pad,
        qk_dtype=jnp.bfloat16 if qk_bf16 else None)

    out_shapes = (
        jax.ShapeDtypeStruct((B, Lq_pad, Dv_pad), out_dtype),    # output
        jax.ShapeDtypeStruct((B, Lq_pad, Lk_pad), attn_dtype),   # attn
        jax.ShapeDtypeStruct((B, Lq_pad, Lk_pad), attn_dtype),   # log_attn
    )

    # K/V block index depends only on the batch axis; single-buffer them when
    # VMEM is tight (new DMA needed only once per batch element).
    kv_kwargs = {"pipeline_mode": pl.Buffered(1)} if kv_buf == 1 else {}

    grid_spec = pltpu.PrefetchScalarGridSpec(
        num_scalar_prefetch=0,
        grid=grid,
        in_specs=[
            pl.BlockSpec((bb, tq, D), lambda b, i: (b, i, 0)),               # q: tiled over Lq
            pl.BlockSpec((bb, Lk_pad, D), lambda b, i: (b, 0, 0), **kv_kwargs),   # k resident
            pl.BlockSpec((bb, Lk_pad, Dv_pad), lambda b, i: (b, 0, 0), **kv_kwargs),  # v resident
        ],
        out_specs=[
            pl.BlockSpec((bb, tq, Dv_pad), lambda b, i: (b, i, 0)),
            pl.BlockSpec((bb, tq, Lk_pad), lambda b, i: (b, i, 0)),
            pl.BlockSpec((bb, tq, Lk_pad), lambda b, i: (b, i, 0)),
        ],
    )

    # Megacore (v7x): shard the batch axis across the two TensorCores when there
    # are >= 2 batch blocks, so each core keeps its own K/V blocks resident
    # instead of both cores re-DMA-ing the same K/V for different Lq tiles.
    if B // bb >= 2:
        dims = ("parallel", "arbitrary")
    else:
        dims = ("arbitrary", "parallel")

    out, attn, log_attn = pl.pallas_call(
        kernel,
        out_shape=out_shapes,
        grid_spec=grid_spec,
        compiler_params=pltpu.CompilerParams(
            dimension_semantics=dims,
            vmem_limit_bytes=int(min(0.9 * vmem_cap, 100 * 1024 * 1024)),
        ),
    )(qp, kp, vp)

    # Slice padded dims back to the caller's shapes.
    if (Lq_pad, Dv_pad) != (Lq, Dv):
        out = out[:, :Lq, :Dv]
    if (Lq_pad, Lk_pad) != (Lq, Lk):
        attn = attn[:, :Lq, :Lk]
        log_attn = log_attn[:, :Lq, :Lk]
    return out, attn, log_attn


if __name__ == "__main__":
    def _reference(q, k, v, temperature):
        s = jnp.einsum("bqd,bkd->bqk", q, k) / temperature
        attn = jax.nn.softmax(s, axis=-1)
        log_attn = jax.nn.log_softmax(s, axis=-1)
        out = jnp.einsum("bqk,bkd->bqd", attn, v)
        return out, attn, log_attn

    key = jax.random.PRNGKey(0)

    # Case 1: small shapes typical of the module's few-shot usage.
    kq, kk, kv, key = jax.random.split(key, 4)
    B, Lq, Lk, D, Dv = 2, 8, 8, 32, 32
    q = jax.random.normal(kq, (B, Lq, D), dtype=jnp.float32)
    k = jax.random.normal(kk, (B, Lk, D), dtype=jnp.float32)
    v = jax.random.normal(kv, (B, Lk, Dv), dtype=jnp.float32)
    temperature = float(D) ** 0.5

    out, attn, log_attn = scaled_dot_product_attention(q, k, v, temperature)
    jax.block_until_ready((out, attn, log_attn))
    out_r, attn_r, log_r = _reference(q, k, v, temperature)
    assert out.shape == out_r.shape and attn.shape == attn_r.shape
    assert jnp.allclose(attn, attn_r, atol=1e-3, rtol=1e-3), "attn mismatch (case 1)"
    assert jnp.allclose(log_attn, log_r, atol=1e-3, rtol=1e-3), "log_attn mismatch (case 1)"
    assert jnp.allclose(out, out_r, atol=1e-3, rtol=1e-3), "output mismatch (case 1)"

    # Case 2: non-128-aligned Lk/Dv exercises the lane-dense padding + column-mask path.
    kq, kk, kv, key = jax.random.split(key, 4)
    B, Lq, Lk, D, Dv = 2, 136, 160, 32, 48
    q = jax.random.normal(kq, (B, Lq, D), dtype=jnp.float32)
    k = jax.random.normal(kk, (B, Lk, D), dtype=jnp.float32)
    v = jax.random.normal(kv, (B, Lk, Dv), dtype=jnp.float32)
    temperature = float(D) ** 0.5

    out, attn, log_attn = scaled_dot_product_attention(q, k, v, temperature)
    jax.block_until_ready((out, attn, log_attn))
    out_r, attn_r, log_r = _reference(q, k, v, temperature)
    assert out.shape == out_r.shape and attn.shape == attn_r.shape
    assert jnp.allclose(attn, attn_r, atol=1e-3, rtol=1e-3), "attn mismatch (case 2)"
    assert jnp.allclose(log_attn, log_r, atol=1e-3, rtol=1e-3), "log_attn mismatch (case 2)"
    assert jnp.allclose(out, out_r, atol=1e-3, rtol=1e-3), "output mismatch (case 2)"

    print("KERNEL_OK")
</pallas_src>

<mosaic_0001>
module attributes {stable_mosaic.version = 11 : i64} {
  func.func @_sdpa_kernel(%arg0: i32, %arg1: i32, %arg2: memref<2x8x32xf32, #tpu.memory_space<vmem>>, %arg3: memref<2x8x32xf32, #tpu.memory_space<vmem>>, %arg4: memref<2x8x32xf32, #tpu.memory_space<vmem>>, %arg5: memref<2x8x32xf32, #tpu.memory_space<vmem>>, %arg6: memref<2x8x8xf32, #tpu.memory_space<vmem>>, %arg7: memref<2x8x8xf32, #tpu.memory_space<vmem>>) attributes {dimension_semantics = [#tpu.dimension_semantics<arbitrary>, #tpu.dimension_semantics<parallel>], iteration_bounds = array<i64: 1, 1>, scalar_prefetch = 0 : i64, scratch_operands = 0 : i64, tpu.core_type = #tpu.core_type<tc>, window_params = [{transform_indices = @transform_0, window_bounds = array<i64: 2, 8, 32>}, {transform_indices = @transform_1, window_bounds = array<i64: 2, 8, 32>}, {transform_indices = @transform_2, window_bounds = array<i64: 2, 8, 32>}, {transform_indices = @transform_3, window_bounds = array<i64: 2, 8, 32>}, {transform_indices = @transform_4, window_bounds = array<i64: 2, 8, 8>}, {transform_indices = @transform_5, window_bounds = array<i64: 2, 8, 8>}]} {
    %c0 = arith.constant 0 : index
    %c0_0 = arith.constant 0 : index
    %c0_1 = arith.constant 0 : index
    %0 = vector.load %arg2[%c0, %c0_0, %c0_1] : memref<2x8x32xf32, #tpu.memory_space<vmem>>, vector<2x8x32xf32>
    %cst = arith.constant 0.176776692 : f32
    %1 = vector.broadcast %cst : f32 to vector<2x8x32xf32>
    %2 = arith.mulf %0, %1 : vector<2x8x32xf32>
    %c0_2 = arith.constant 0 : index
    %c0_3 = arith.constant 0 : index
    %c0_4 = arith.constant 0 : index
    %3 = vector.load %arg3[%c0_2, %c0_3, %c0_4] : memref<2x8x32xf32, #tpu.memory_space<vmem>>, vector<2x8x32xf32>
    %cst_5 = arith.constant dense<0.000000e+00> : vector<2x8x8xf32>
    %4 = tpu.matmul %2, %3, %cst_5 {dimension_numbers = #tpu.dot_dimension_numbers<[2], [2], [1], [1], [0, 0, 0, 1, 1, 1], [0], [0]>} : vector<2x8x32xf32>, vector<2x8x32xf32>, vector<2x8x8xf32> -> vector<2x8x8xf32>
    %cst_6 = arith.constant dense<0xFF800000> : vector<2x8xf32>
    %5 = vector.multi_reduction <maximumf>, %4, %cst_6 [2] : vector<2x8x8xf32> to vector<2x8xf32>
    %6 = vector.shape_cast %5 : vector<2x8xf32> to vector<2x8x1xf32>
    %7 = vector.broadcast %6 : vector<2x8x1xf32> to vector<2x8x8xf32>
    %8 = arith.subf %4, %7 : vector<2x8x8xf32>
    %9 = math.exp %8 : vector<2x8x8xf32>
    %cst_7 = arith.constant dense<0.000000e+00> : vector<2x8xf32>
    %10 = vector.multi_reduction <add>, %9, %cst_7 [2] : vector<2x8x8xf32> to vector<2x8xf32>
    %11 = vector.shape_cast %10 : vector<2x8xf32> to vector<2x8x1xf32>
    %12 = math.log %11 : vector<2x8x1xf32>
    %13 = vector.broadcast %12 : vector<2x8x1xf32> to vector<2x8x8xf32>
    %14 = arith.subf %8, %13 : vector<2x8x8xf32>
    %c0_8 = arith.constant 0 : index
    %c0_9 = arith.constant 0 : index
    %c0_10 = arith.constant 0 : index
    %15 = vector.load %arg7[%c0_8, %c0_9, %c0_10] : memref<2x8x8xf32, #tpu.memory_space<vmem>>, vector<2x8x8xf32>
    tpu.vector_store %arg7[%c0_8, %c0_9, %c0_10], %14 {strides = array<i32>} : memref<2x8x8xf32, #tpu.memory_space<vmem>>, vector<2x8x8xf32>,
    %16 = tpu.reciprocal %11 : vector<2x8x1xf32> -> vector<2x8x1xf32>
    %17 = vector.broadcast %16 : vector<2x8x1xf32> to vector<2x8x8xf32>
    %18 = arith.mulf %9, %17 : vector<2x8x8xf32>
    %c0_11 = arith.constant 0 : index
    %c0_12 = arith.constant 0 : index
    %c0_13 = arith.constant 0 : index
    %19 = vector.load %arg6[%c0_11, %c0_12, %c0_13] : memref<2x8x8xf32, #tpu.memory_space<vmem>>, vector<2x8x8xf32>
    tpu.vector_store %arg6[%c0_11, %c0_12, %c0_13], %18 {strides = array<i32>} : memref<2x8x8xf32, #tpu.memory_space<vmem>>, vector<2x8x8xf32>,
    %c0_14 = arith.constant 0 : index
    %c0_15 = arith.constant 0 : index
    %c0_16 = arith.constant 0 : index
    %20 = vector.load %arg4[%c0_14, %c0_15, %c0_16] : memref<2x8x32xf32, #tpu.memory_space<vmem>>, vector<2x8x32xf32>
    %cst_17 = arith.constant dense<0.000000e+00> : vector<2x8x32xf32>
    %21 = tpu.matmul %18, %20, %cst_17 {dimension_numbers = #tpu.dot_dimension_numbers<[2], [1], [1], [2], [0, 0, 0, 1, 1, 2], [0], [0]>} : vector<2x8x8xf32>, vector<2x8x32xf32>, vector<2x8x32xf32> -> vector<2x8x32xf32>
    %c0_18 = arith.constant 0 : index
    %c0_19 = arith.constant 0 : index
    %c0_20 = arith.constant 0 : index
    %22 = vector.load %arg5[%c0_18, %c0_19, %c0_20] : memref<2x8x32xf32, #tpu.memory_space<vmem>>, vector<2x8x32xf32>
    tpu.vector_store %arg5[%c0_18, %c0_19, %c0_20], %21 {strides = array<i32>} : memref<2x8x32xf32, #tpu.memory_space<vmem>>, vector<2x8x32xf32>,
    return
  }
  func.func @transform_0(%arg0: i32, %arg1: i32) -> (i32, i32, i32) {
    %c0_i32 = arith.constant 0 : i32
    %c0_i32_0 = arith.constant 0 : i32
    return %arg0, %arg1, %c0_i32 : i32, i32, i32
  }
  func.func @transform_1(%arg0: i32, %arg1: i32) -> (i32, i32, i32) {
    %c0_i32 = arith.constant 0 : i32
    %c0_i32_0 = arith.constant 0 : i32
    %c0_i32_1 = arith.constant 0 : i32
    return %arg0, %c0_i32, %c0_i32_0 : i32, i32, i32
  }
  func.func @transform_2(%arg0: i32, %arg1: i32) -> (i32, i32, i32) {
    %c0_i32 = arith.constant 0 : i32
    %c0_i32_0 = arith.constant 0 : i32
    %c0_i32_1 = arith.constant 0 : i32
    return %arg0, %c0_i32, %c0_i32_0 : i32, i32, i32
  }
  func.func @transform_3(%arg0: i32, %arg1: i32) -> (i32, i32, i32) {
    %c0_i32 = arith.constant 0 : i32
    %c0_i32_0 = arith.constant 0 : i32
    return %arg0, %arg1, %c0_i32 : i32, i32, i32
  }
  func.func @transform_4(%arg0: i32, %arg1: i32) -> (i32, i32, i32) {
    %c0_i32 = arith.constant 0 : i32
    %c0_i32_0 = arith.constant 0 : i32
    return %arg0, %arg1, %c0_i32 : i32, i32, i32
  }
  func.func @transform_5(%arg0: i32, %arg1: i32) -> (i32, i32, i32) {
    %c0_i32 = arith.constant 0 : i32
    %c0_i32_0 = arith.constant 0 : i32
    return %arg0, %arg1, %c0_i32 : i32, i32, i32
  }
}

</mosaic_0001>

<bundles_post_ra>
// kernel: tpu_custom_call.1
= control target key start
LH: loop header
LB: loop body
LE: loop exit
PB: predicated region body
PF: predicated region fallthrough
CT: control target
= control target key end

     0   :  { %11 = vsyncpa [#allocation3], 0  ;;  %s557_s0 = inlined_call_operand.hbm [shape: f32[2,8,32], index: 0, kind: input, shape index: {}]   ;;  %s558_s1 = inlined_call_operand.hbm [shape: f32[2,8,32], index: 1, kind: input, shape index: {}]   ;;  %s559_s2 = inlined_call_operand.hbm [shape: f32[2,8,32], index: 2, kind: input, shape index: {}]   ;;  %s560_s3 = inlined_call_operand.hbm [shape: f32[2,8,32], index: 3, kind: output, shape index: {0}]   ;;  %s561_s4 = inlined_call_operand.hbm [shape: f32[2,8,8], index: 4, kind: output, shape index: {1}]   ;;  %s562_s5 = inlined_call_operand.hbm [shape: f32[2,8,8], index: 5, kind: output, shape index: {2}]  }
   0x1   :  { %12 = vsyncpa [#allocation6], 0 }
   0x2   :  { %13 = vsyncpa [#allocation4], 0 }
   0x3   :  { %14 = vsyncpa [#allocation10], 0  ;;  %s32_s20 = sshll.u32 %s558_s1, 4  ;;  %s467_s21 = smov [#allocation5]   ;;  %s33_s20 = int_to_ptr.hbm [resolvable:$true] %s32_s20 }
   0x4   :  { %s34_s22 = sshll.u32 %s467_s21, 4  ;;  %s19_s25 = sshll.u32 %s557_s0, 4  ;;  %s35_s22 = int_to_ptr.vmem [resolvable:$true] %s34_s22  ;;  %s20_s25 = int_to_ptr.hbm [resolvable:$true] %s19_s25 }
   0x5   :  { %s468_s26 = smov 128   ;;  %s469_s27 = smov 8  }
   0x6   :  { %40 = dma.hbm_to_vmem [thread:$0]  %s33_s20, 256, %s35_s22, [#allocation6], %s468_s26, %s468_s26, %s469_s27  }
   0x7   :  { %s470_s28 = smov [#allocation2]   ;;  %s45_s1 = sshll.u32 %s559_s2, 4  ;;  %s46_s1 = int_to_ptr.hbm [resolvable:$true] %s45_s1 }
   0x8   :  { %s21_s29 = sshll.u32 %s470_s28, 4  ;;  %s471_s0 = smov [#allocation7]   ;;  %s22_s29 = int_to_ptr.vmem [resolvable:$true] %s21_s29 }
   0x9   :  { %27 = dma.hbm_to_vmem [thread:$0]  %s20_s25, 256, %s22_s29, [#allocation3], %s468_s26, %s468_s26, %s469_s27  }
   0xa   :  { %s47_s7 = sshll.u32 %s471_s0, 4  ;;  %s48_s7 = int_to_ptr.vmem [resolvable:$true] %s47_s7 }
   0xb   :  { %53 = dma.hbm_to_vmem [thread:$0]  %s46_s1, 256, %s48_s7, [#allocation6], %s468_s26, %s468_s26, %s469_s27  }
   0xc   :  { %459 = dma.done.wait [#allocation3], 256  }
   0xd   :  { %460 = vsyncadd [#allocation3], 4294967040 }
   0xe   :  { %461 = dma.done.wait [#allocation6], 512  }
   0xf   :  { %462 = vsyncadd [#allocation6], 4294966784  ;;  %vm72_vm0 = vcmask 261120   ;;  %v70_v0 = vld [vmem:[#allocation5] sm:$0xff]  ;;  %v66_v1 = vld [vmem:[#allocation2] sm:$0xff]  ;;  %vm125_vm1 = vcmask 64512  }
  0x10   :  { %v71_v2 = vld [vmem:[#allocation5 + $0x8] sm:$0xff]  ;;  %289 = vmatpush.xpose.msk.msra.mxu0 %vm72_vm0, %v70_v0  ;;  %v68_v3 = vmul.f32 0.17677669, %v66_v1  ;;  %v67_v4 = vld [vmem:[#allocation2 + $0x8] sm:$0xff]  ;;  %v184_v20 = vld [vmem:[#allocation7] sm:$0xff]  ;;  %s472_s2 = smov [#allocation9]  }
  0x11   :  { %291 = vmatpush.xpose.msk.msra.mxu1 %vm72_vm0, %v71_v2  ;;  %v69_v5 = vmul.f32 0.17677669, %v67_v4  ;;  %204 = vmatpush.msra.mxu2 %v184_v20  ;;  %v185_v21 = vld [vmem:[#allocation7 + $0x8] sm:$0xff]  ;;  %s251_s8 = sshll.u32 %s472_s2, 4  ;;  %s253_s11 = sshll.u32 %s561_s4, 4  ;;  %s252_s8 = int_to_ptr.vmem [resolvable:$true] %s251_s8  ;;  %s254_s11 = int_to_ptr.hbm [resolvable:$true] %s253_s11 }
  0x12   :  { %227 = vmatpush.msra.mxu3 %v185_v21  ;;  %s473_s12 = smov [#allocation11]   ;;  %s266_s16 = sshll.u32 %s562_s5, 4  ;;  %s267_s16 = int_to_ptr.hbm [resolvable:$true] %s266_s16 }
  0x13   :  { %290 = vmatmul.msk.f32.vlgmr.msra.gmra.mxu0 %vm72_vm0, %v68_v3  ;;  %s264_s13 = sshll.u32 %s473_s12, 4  ;;  %s474_s4 = smov [#allocation8]   ;;  %s265_s13 = int_to_ptr.vmem [resolvable:$true] %s264_s13 }
  0x14   :  { %292 = vmatmul.msk.f32.vlgmr.msra.gmra.mxu1 %vm72_vm0, %v69_v5  ;;  %s238_s17 = sshll.u32 %s474_s4, 4  ;;  %s240_s20 = sshll.u32 %s560_s3, 4  ;;  %s239_s17 = int_to_ptr.vmem [resolvable:$true] %s238_s17  ;;  %s241_s20 = int_to_ptr.hbm [resolvable:$true] %s240_s20 }
  0x90   :  { %v96_v6 = vpop.f32.mrf.mxu0 }
  0x91   :  { %v126_v7 = vsel %vm125_vm1, %v96_v6, -inf  ;;  %v122_v8 = vpop.f32.mrf.mxu1 }
  0x92   :  { %127 = vmax.xlane.f32.xlu0 %v126_v7  ;;  %v129_v9 = vsel %vm125_vm1, %v122_v8, -inf }
  0x9a   :  { %130 = vmax.xlane.f32.xlu0 %v129_v9 }
 0x105   :  { %v128_v10 = vpop.xlane.xlu0 %127 }
 0x106   :  { %v132_v11 = vsub.f32 %v96_v6, %v128_v10 }
 0x108   :  { %v134_v12 = vmul.f32 1.442695, %v132_v11 }
 0x10a   :  { %303 = vpow2.f32 %v134_v12 }
 0x10d   :  { %v131_v13 = vpop.xlane.xlu0 %130 }
 0x10e   :  { %v133_v14 = vsub.f32 %v122_v8, %v131_v13 }
 0x110   :  { %v304_v15 = vpop.eup %303  ;;  %v136_v16 = vmul.f32 1.442695, %v133_v14 }
 0x111   :  { %v138_v17 = vsel %vm125_vm1, %v304_v15, 0.0 }
 0x112   :  { %305 = vpow2.f32 %v136_v16  ;;  %139 = vadd.xlane.f32.xlu1 %v138_v17 }
 0x118   :  { %v306_v18 = vpop.eup %305 }
 0x119   :  { %v141_v19 = vsel %vm125_vm1, %v306_v18, 0.0 }
 0x11a   :  { %142 = vadd.xlane.f32.xlu1 %v141_v19 }
 0x185   :  { %v140_v22 = vpop.xlane.xlu1 %139 }
 0x186   :  { %307 = vlog2.f32 %v140_v22  ;;  %v163_v30 = vand.u32 2147483648, %v140_v22  ;;  %v161_v32 = vand.u32 2147483647, %v140_v22  ;;  %vm157_vm3 = vweird.f32 %v140_v22 }
 0x187   :  { %309 = vrcp.f32 %v140_v22 }
 0x188   :  { %v164_v37 = vor.u32 1.1754944e-38, %v163_v30  ;;  %vm162_vm5 = vcmp.eq.f32.partialorder %v161_v32, 8.507059e+37 }
 0x18c   :  { %v308_v23 = vpop.eup %307 }
 0x18d   :  { %v310_v24 = vpop.eup %309  ;;  %v145_v25 = vmul.f32 0.6931472, %v308_v23  ;;  %v143_v26 = vpop.xlane.xlu1 %142 }
 0x18e   :  { %v153_v27 = vmul.f32 %v310_v24, %v140_v22  ;;  %311 = vlog2.f32 %v143_v26  ;;  %vm158_vm2 = vweird.f32 %v310_v24  ;;  %v177_v44 = vand.u32 2147483648, %v143_v26 }
 0x18f   :  { %313 = vrcp.f32 %v143_v26  ;;  %v148_v28 = vsub.f32 %v132_v11, %v145_v25  ;;  %vm159_vm4 = vmor %vm157_vm3, %vm158_vm2  ;;  %v175_v46 = vand.u32 2147483647, %v143_v26  ;;  %vm171_vm7 = vweird.f32 %v143_v26 }
 0x190   :  { %v154_v29 = vsub.f32 1.0, %v153_v27  ;;  %v178_v48 = vor.u32 1.1754944e-38, %v177_v44 }
 0x191   :  { %150 = vst.msk [vmem:[#allocation11] sm:$0xff] %vm125_vm1, %v148_v28  ;;  %vm176_vm9 = vcmp.eq.f32.partialorder %v175_v46, 8.507059e+37 }
 0x192   :  { %v155_v31 = vmul.f32 %v310_v24, %v154_v29 }
 0x194   :  { %v312_v33 = vpop.eup %311  ;;  %v156_v34 = vadd.f32 %v310_v24, %v155_v31 }
 0x195   :  { %v314_v35 = vpop.eup %313  ;;  %v147_v36 = vmul.f32 0.6931472, %v312_v33 }
 0x196   :  { %v167_v38 = vmul.f32 %v314_v35, %v143_v26  ;;  %v160_v39 = vsel %vm159_vm4, %v310_v24, %v156_v34  ;;  %vm172_vm6 = vweird.f32 %v314_v35 }
 0x197   :  { %v149_v40 = vsub.f32 %v133_v14, %v147_v36  ;;  %v165_v41 = vsel %vm162_vm5, %v164_v37, %v160_v39  ;;  %vm173_vm8 = vmor %vm171_vm7, %vm172_vm6 }
 0x198   :  { %v168_v42 = vsub.f32 1.0, %v167_v38  ;;  %v180_v43 = vmul.f32 %v304_v15, %v165_v41 }
 0x199   :  { %151 = vst.msk [vmem:[#allocation11 + $0x8] sm:$0xff] %vm125_vm1, %v149_v40 }
 0x19a   :  { %v169_v45 = vmul.f32 %v314_v35, %v168_v42  ;;  %293 = vmatmul.msk.f32.vlgmr.msra.gmra.mxu2 %vm125_vm1, %v180_v43  ;;  %182 = vst.msk [vmem:[#allocation9] sm:$0xff] %vm125_vm1, %v180_v43 }
 0x19c   :  { %v170_v47 = vadd.f32 %v314_v35, %v169_v45 }
 0x19e   :  { %v174_v49 = vsel %vm173_vm8, %v314_v35, %v170_v47 }
 0x19f   :  { %v179_v50 = vsel %vm176_vm9, %v178_v48, %v174_v49 }
 0x1a0   :  { %v181_v51 = vmul.f32 %v306_v18, %v179_v50 }
 0x1a2   :  { %294 = vmatmul.msk.f32.vlgmr.msra.gmra.mxu3 %vm125_vm1, %v181_v51  ;;  %183 = vst.msk [vmem:[#allocation9 + $0x8] sm:$0xff] %vm125_vm1, %v181_v51 }
 0x1a3   :  { %259 = dma.vmem_to_hbm [thread:$0]  %s252_s8, 256, %s254_s11, [#allocation10], %s468_s26, %s468_s26, %s469_s27  }
 0x1a4   :  { %272 = dma.vmem_to_hbm [thread:$0]  %s265_s13, 256, %s267_s16, [#allocation10], %s468_s26, %s468_s26, %s469_s27  }
 0x21d   :  { %v206_v52 = vpop.f32.mrf.mxu2 }
 0x21e   :  { %232 = vst.msk [vmem:[#allocation8] sm:$0xff] %vm72_vm0, %v206_v52 }
 0x225   :  { %v229_v53 = vpop.f32.mrf.mxu3 }
 0x226   :  { %233 = vst.msk [vmem:[#allocation8 + $0x8] sm:$0xff] %vm72_vm0, %v229_v53 }
 0x227   :  { %246 = dma.vmem_to_hbm [thread:$0]  %s239_s17, 256, %s241_s20, [#allocation4], %s468_s26, %s468_s26, %s469_s27  }
 0x228   :  { %463 = dma.done.wait [#allocation4], 256  }
 0x229   :  { %464 = vsyncadd [#allocation4], 4294967040 }
 0x22a   :  { %465 = dma.done.wait [#allocation10], 512  }
 0x22b   :  { %466 = vsyncadd [#allocation10], 4294966784 }
 0x22c   :  { %285 = vsyncpa [#allocation3], 1 }
 0x22d   :  { %286 = vsyncpa [#allocation6], 1 }
 0x22e   :  { %287 = vsyncpa [#allocation4], 1 }
 0x22f   :  { %288 = vsyncpa [#allocation10], 1 }

</bundles_post_ra>
